<compile_context>
chip_gen: v7x
topology: tpu7x:2x2x1
jax: 0.10.0
libtpu: 0.0.40
codegen_flags: <defaults>
</compile_context>

<pallas_src>
import math

import jax
import jax.numpy as jnp
from jax.experimental import pallas as pl
from jax.experimental.pallas import tpu as pltpu


def ffn_kernel(x_ref, w1_ref, b1_ref, w2_ref, b2_ref, o_ref):
    """One (tn, D) row block x one tf-wide slice of the hidden dim.

    y = relu(x @ W1 + b1) @ W2 + b2, accumulated over d_ff slices directly
    into the f32 output block (its block index is constant over k).
    """
    k = pl.program_id(1)

    @pl.when(k == 0)
    def _init():
        # Output doubles as the f32 accumulator; seed it with the final bias.
        o_ref[...] = jnp.broadcast_to(b2_ref[...], o_ref.shape)

    # First linear + ReLU on this d_ff slice (bf16 MXU, f32 accumulate).
    h = jnp.dot(x_ref[...], w1_ref[...], preferred_element_type=jnp.float32)
    h = jnp.maximum(h + b1_ref[...], 0.0)
    # TODO(synk): nn.Dropout(p=0.1) in training mode has no deterministic
    # equivalent; treated as identity (eval mode / p = 0).

    # Second linear: accumulate this slice's contribution into the output.
    o_ref[...] += jnp.dot(h.astype(jnp.bfloat16), w2_ref[...],
                          preferred_element_type=jnp.float32)


def positionwise_feed_forward(x, w1, b1, w2, b2, *,
                              block_rows=512, block_ff=None,
                              vmem_limit_bytes=None):
    """x: (B, S, D) f32.  w1: (D, DFF), w2: (DFF, D) stored (in, out) so
    y = x @ W + b matches nn.Linear.  Returns (B, S, D) f32."""
    B, S, D = x.shape
    DFF = w1.shape[1]
    N = B * S
    assert x.dtype == jnp.float32, "f32 output is used as the accumulator"

    # Per-TensorCore VMEM capacity (64 MiB on v7x, 128 MiB on v5e/v6e).
    try:
        vmem_cap = int(pltpu.get_tpu_info().vmem_capacity_bytes)
    except Exception:
        vmem_cap = 64 * 1024 * 1024           # conservative fallback (v7x per TC)
    budget = int(vmem_cap * 0.70)             # headroom for compiler scratch

    # Row tile: as big as allowed, multiple of 16 (bf16 sublane packing).
    tn = min(block_rows, N)
    assert N % tn == 0 and (tn == N or tn % 16 == 0), (N, tn)

    def working_set_bytes(tf, w_bufs):
        return (w_bufs * 2 * D * tf * 2       # W1 + W2 slices (bf16), w_bufs buffers
                + 2 * tn * D * 2              # x row tile (bf16), 2 buffers
                + 2 * tn * D * 4              # output/accumulator (f32), 2 buffers
                + 2 * (tf + D) * 4)           # biases (f32)

    if block_ff is None:
        # Prefer full weight residency: each weight is DMA'd from HBM once.
        tf = DFF
        while tf > 128 and working_set_bytes(tf, 2 if tf == DFF else 3) > budget:
            tf //= 2
    else:
        tf = min(block_ff, DFF)
    assert DFF % tf == 0 and (tf == DFF or tf % 128 == 0), (DFF, tf)
    k_steps = DFF // tf
    resident = k_steps == 1

    # Host-side casts: bf16 activations/weights (MXU inputs), f32 biases.
    x2 = x.reshape(N, D).astype(jnp.bfloat16)
    w1_bf = w1.astype(jnp.bfloat16)
    w2_bf = w2.astype(jnp.bfloat16)
    b1_2d = b1.reshape(1, DFF).astype(jnp.float32)
    b2_2d = b2.reshape(1, D).astype(jnp.float32)

    if resident:
        # Grid-constant index maps -> weights stay VMEM-resident for all row tiles.
        w1_spec = pl.BlockSpec((D, DFF), lambda i, k: (0, 0))
        b1_spec = pl.BlockSpec((1, DFF), lambda i, k: (0, 0))
        w2_spec = pl.BlockSpec((DFF, D), lambda i, k: (0, 0))
    else:
        # Streaming d_ff: triple-buffer the weight slices to hide their DMA.
        w1_spec = pl.BlockSpec((D, tf), lambda i, k: (0, k),
                               pipeline_mode=pl.Buffered(3))
        b1_spec = pl.BlockSpec((1, tf), lambda i, k: (0, k))
        w2_spec = pl.BlockSpec((tf, D), lambda i, k: (k, 0),
                               pipeline_mode=pl.Buffered(3))

    if vmem_limit_bytes is None:
        vmem_limit_bytes = min(int(vmem_cap * 0.90), 110 * 1024 * 1024)

    grid = (N // tn, k_steps)

    out = pl.pallas_call(
        ffn_kernel,
        out_shape=jax.ShapeDtypeStruct((N, D), jnp.float32),
        grid_spec=pltpu.PrefetchScalarGridSpec(
            num_scalar_prefetch=0,
            grid=grid,
            in_specs=[
                pl.BlockSpec((tn, D), lambda i, k: (i, 0)),   # x rows (constant over k)
                w1_spec,                                      # W1 (resident or sliced)
                b1_spec,                                      # b1
                w2_spec,                                      # W2 (resident or sliced)
                pl.BlockSpec((1, D), lambda i, k: (0, 0)),    # b2 (constant)
            ],
            out_specs=pl.BlockSpec((tn, D), lambda i, k: (i, 0)),
        ),
        compiler_params=pltpu.CompilerParams(
            dimension_semantics=("parallel", "arbitrary"),
            vmem_limit_bytes=vmem_limit_bytes,
        ),
    )(x2, w1_bf, b1_2d, w2_bf, b2_2d)
    return out.reshape(B, S, D)


# ------------------------- pure-JAX reference -------------------------
def ffn_reference(x, w1, b1, w2, b2):
    h = jnp.maximum(x @ w1 + b1, 0.0)
    return h @ w2 + b2


if __name__ == "__main__":
    # Small but lane-dense shapes (D, DFF multiples of 128; rows multiple of 16).
    B, S, D, DFF = 2, 64, 128, 512

    key = jax.random.PRNGKey(0)
    k_x, k_w1, k_b1, k_w2, k_b2 = jax.random.split(key, 5)

    x = jax.random.normal(k_x, (B, S, D), jnp.float32)
    w1 = jax.random.normal(k_w1, (D, DFF), jnp.float32) / math.sqrt(D)
    b1 = 0.1 * jax.random.normal(k_b1, (DFF,), jnp.float32)
    w2 = jax.random.normal(k_w2, (DFF, D), jnp.float32) / math.sqrt(DFF)
    b2 = 0.1 * jax.random.normal(k_b2, (D,), jnp.float32)

    ref = ffn_reference(x, w1, b1, w2, b2)

    # Path 1: weight-resident configuration (tf == DFF) — the expected fast path.
    out_res = jax.block_until_ready(positionwise_feed_forward(x, w1, b1, w2, b2))
    assert out_res.shape == (B, S, D)
    err_res = float(jnp.max(jnp.abs(out_res - ref)))
    assert jnp.allclose(out_res, ref, rtol=2e-2, atol=2e-2), err_res

    # Path 2: forced d_ff streaming (exercises accumulate-over-k + Buffered(3)).
    out_str = jax.block_until_ready(
        positionwise_feed_forward(x, w1, b1, w2, b2, block_rows=64, block_ff=128))
    err_str = float(jnp.max(jnp.abs(out_str - ref)))
    assert jnp.allclose(out_str, ref, rtol=2e-2, atol=2e-2), err_str

    print("KERNEL_OK")
</pallas_src>

<mosaic_0001>
module attributes {stable_mosaic.version = 11 : i64} {
  func.func @ffn_kernel(%arg0: i32, %arg1: i32, %arg2: memref<128x128xbf16, #tpu.memory_space<vmem>>, %arg3: memref<128x512xbf16, #tpu.memory_space<vmem>>, %arg4: memref<1x512xf32, #tpu.memory_space<vmem>>, %arg5: memref<512x128xbf16, #tpu.memory_space<vmem>>, %arg6: memref<1x128xf32, #tpu.memory_space<vmem>>, %arg7: memref<128x128xf32, #tpu.memory_space<vmem>>) attributes {dimension_semantics = [#tpu.dimension_semantics<parallel>, #tpu.dimension_semantics<arbitrary>], iteration_bounds = array<i64: 1, 1>, scalar_prefetch = 0 : i64, scratch_operands = 0 : i64, tpu.core_type = #tpu.core_type<tc>, window_params = [{transform_indices = @transform_0, window_bounds = array<i64: 128, 128>}, {pipeline_mode = #tpu.pipeline_mode<synchronous>, transform_indices = @transform_1, window_bounds = array<i64: 128, 512>}, {pipeline_mode = #tpu.pipeline_mode<synchronous>, transform_indices = @transform_2, window_bounds = array<i64: 1, 512>}, {pipeline_mode = #tpu.pipeline_mode<synchronous>, transform_indices = @transform_3, window_bounds = array<i64: 512, 128>}, {pipeline_mode = #tpu.pipeline_mode<synchronous>, transform_indices = @transform_4, window_bounds = array<i64: 1, 128>}, {transform_indices = @transform_5, window_bounds = array<i64: 128, 128>}]} {
    %c0_i32 = arith.constant 0 : i32
    %0 = arith.cmpi eq, %arg1, %c0_i32 : i32
    %1 = arith.extui %0 : i1 to i32
    %c0_i32_0 = arith.constant 0 : i32
    %2 = arith.cmpi ne, %1, %c0_i32_0 : i32
    scf.if %2 {
      %c0_14 = arith.constant 0 : index
      %c0_15 = arith.constant 0 : index
      %17 = vector.load %arg6[%c0_14, %c0_15] : memref<1x128xf32, #tpu.memory_space<vmem>>, vector<1x128xf32>
      %18 = vector.shape_cast %17 : vector<1x128xf32> to vector<1x128xf32>
      %19 = vector.broadcast %18 : vector<1x128xf32> to vector<128x128xf32>
      %c0_16 = arith.constant 0 : index
      %c0_17 = arith.constant 0 : index
      %20 = vector.load %arg7[%c0_16, %c0_17] : memref<128x128xf32, #tpu.memory_space<vmem>>, vector<128x128xf32>
      tpu.vector_store %arg7[%c0_16, %c0_17], %19 {strides = array<i32>} : memref<128x128xf32, #tpu.memory_space<vmem>>, vector<128x128xf32>,
    } else {
    }
    %c0 = arith.constant 0 : index
    %c0_1 = arith.constant 0 : index
    %3 = vector.load %arg2[%c0, %c0_1] : memref<128x128xbf16, #tpu.memory_space<vmem>>, vector<128x128xbf16>
    %c0_2 = arith.constant 0 : index
    %c0_3 = arith.constant 0 : index
    %4 = vector.load %arg3[%c0_2, %c0_3] : memref<128x512xbf16, #tpu.memory_space<vmem>>, vector<128x512xbf16>
    %cst = arith.constant dense<0.000000e+00> : vector<128x512xf32>
    %5 = tpu.matmul %3, %4, %cst {dimension_numbers = #tpu.dot_dimension_numbers<[1], [0], [0], [1], [0, 0, 1, 1], [], []>} : vector<128x128xbf16>, vector<128x512xbf16>, vector<128x512xf32> -> vector<128x512xf32>
    %c0_4 = arith.constant 0 : index
    %c0_5 = arith.constant 0 : index
    %6 = vector.load %arg4[%c0_4, %c0_5] : memref<1x512xf32, #tpu.memory_space<vmem>>, vector<1x512xf32>
    %7 = vector.broadcast %6 : vector<1x512xf32> to vector<128x512xf32>
    %8 = arith.addf %5, %7 : vector<128x512xf32>
    %cst_6 = arith.constant 0.000000e+00 : f32
    %9 = vector.broadcast %cst_6 : f32 to vector<128x512xf32>
    %10 = arith.maximumf %8, %9 : vector<128x512xf32>
    %c0_7 = arith.constant 0 : index
    %c0_8 = arith.constant 0 : index
    %11 = vector.load %arg7[%c0_7, %c0_8] : memref<128x128xf32, #tpu.memory_space<vmem>>, vector<128x128xf32>
    %12 = arith.truncf %10 : vector<128x512xf32> to vector<128x512xbf16>
    %c0_9 = arith.constant 0 : index
    %c0_10 = arith.constant 0 : index
    %13 = vector.load %arg5[%c0_9, %c0_10] : memref<512x128xbf16, #tpu.memory_space<vmem>>, vector<512x128xbf16>
    %cst_11 = arith.constant dense<0.000000e+00> : vector<128x128xf32>
    %14 = tpu.matmul %12, %13, %cst_11 {dimension_numbers = #tpu.dot_dimension_numbers<[1], [0], [0], [1], [0, 0, 1, 1], [], []>} : vector<128x512xbf16>, vector<512x128xbf16>, vector<128x128xf32> -> vector<128x128xf32>
    %15 = arith.addf %11, %14 : vector<128x128xf32>
    %c0_12 = arith.constant 0 : index
    %c0_13 = arith.constant 0 : index
    %16 = vector.load %arg7[%c0_12, %c0_13] : memref<128x128xf32, #tpu.memory_space<vmem>>, vector<128x128xf32>
    tpu.vector_store %arg7[%c0_12, %c0_13], %15 {strides = array<i32>} : memref<128x128xf32, #tpu.memory_space<vmem>>, vector<128x128xf32>,
    return
  }
  func.func @transform_0(%arg0: i32, %arg1: i32) -> (i32, i32) {
    %c0_i32 = arith.constant 0 : i32
    %c0_i32_0 = arith.constant 0 : i32
    return %arg0, %c0_i32 : i32, i32
  }
  func.func @transform_1(%arg0: i32, %arg1: i32) -> (i32, i32) {
    %c0_i32 = arith.constant 0 : i32
    %c0_i32_0 = arith.constant 0 : i32
    %c0_i32_1 = arith.constant 0 : i32
    return %c0_i32, %c0_i32_0 : i32, i32
  }
  func.func @transform_2(%arg0: i32, %arg1: i32) -> (i32, i32) {
    %c0_i32 = arith.constant 0 : i32
    %c0_i32_0 = arith.constant 0 : i32
    %c0_i32_1 = arith.constant 0 : i32
    return %c0_i32, %c0_i32_0 : i32, i32
  }
  func.func @transform_3(%arg0: i32, %arg1: i32) -> (i32, i32) {
    %c0_i32 = arith.constant 0 : i32
    %c0_i32_0 = arith.constant 0 : i32
    %c0_i32_1 = arith.constant 0 : i32
    return %c0_i32, %c0_i32_0 : i32, i32
  }
  func.func @transform_4(%arg0: i32, %arg1: i32) -> (i32, i32) {
    %c0_i32 = arith.constant 0 : i32
    %c0_i32_0 = arith.constant 0 : i32
    %c0_i32_1 = arith.constant 0 : i32
    return %c0_i32, %c0_i32_0 : i32, i32
  }
  func.func @transform_5(%arg0: i32, %arg1: i32) -> (i32, i32) {
    %c0_i32 = arith.constant 0 : i32
    %c0_i32_0 = arith.constant 0 : i32
    return %arg0, %c0_i32 : i32, i32
  }
}

</mosaic_0001>

<bundles_post_ra>
// kernel: tpu_custom_call.1
= control target key start
LH: loop header
LB: loop body
LE: loop exit
PB: predicated region body
PF: predicated region fallthrough
CT: control target
= control target key end

     0   :  { %10 = vsyncpa [#allocation3], 0  ;;  %s1801_s0 = inlined_call_operand.hbm [shape: bf16[128,128], index: 0, kind: input, shape index: {}]   ;;  %s1802_s1 = inlined_call_operand.hbm [shape: bf16[128,512], index: 1, kind: input, shape index: {}]   ;;  %s1803_s2 = inlined_call_operand.vmem [shape: f32[1,512], index: 2, kind: input, shape index: {}]   ;;  %s1804_s3 = inlined_call_operand.hbm [shape: bf16[512,128], index: 3, kind: input, shape index: {}]   ;;  %s1805_s4 = inlined_call_operand.vmem [shape: f32[1,128], index: 4, kind: input, shape index: {}]   ;;  %s1806_s5 = inlined_call_operand.hbm [shape: f32[128,128], index: 5, kind: output, shape index: {}]  }
   0x1   :  { %11 = vsyncpa [#allocation6], 0 }
   0x2   :  { %12 = vsyncpa [#allocation4], 0  ;;  %s1600_s18 = smov [#allocation5]   ;;  %s1506_s22 = scalar_lea.hbm %s1802_s1, 4096 }
   0x3   :  { %s30_s19 = sshll.u32 %s1600_s18, 4  ;;  %p1507_p0 = scmp.ne.s32.totalorder %s1802_s1, %s1506_s22  ;;  %s31_s19 = int_to_ptr.vmem [resolvable:$true] %s30_s19 }
   0x4   :  { %p1510_p1 = scmp.lt.u32.totalorder %s1506_s22, %s1802_s1 }
   0x6   :  { %p1512_p2 = pnand %p1510_p1, %p1507_p0 }
   0x8   :  { %1515 = shalt.err (!%p1512_p2)
}
   0x9   :  { %s1516_s27 = scalar_lea.vmem %s31_s19, 4096  ;;  %p1521_p4 = scmp.lt.s32.totalorder %s31_s19, %s31_s19 }
   0xa   :  { %p1517_p3 = scmp.ne.s32.totalorder %s31_s19, %s1516_s27  ;;  %p1522_p5 = scmp.lt.s32.totalorder %s1516_s27, %s1516_s27 }
   0xc   :  { %p1523_p6 = por %p1522_p5, %p1521_p4 }
   0xe   :  { %p1524_p7 = pnand %p1523_p6, %p1517_p3 }
  0x10   :  { %1527 = shalt.err (!%p1524_p7)
}
  0x11   :  { %s1601_s28 = smov 256   ;;  %s1602_s29 = smov 16  }
  0x12   :  { %36 = dma.hbm_to_vmem [thread:$0]  %s1802_s1, 4096, %s31_s19, [#allocation6], %s1601_s28, %s1601_s28, %s1602_s29  }
  0x13   :  { %s1603_s7 = smov [#allocation2]   ;;  %s1528_s11 = scalar_lea.hbm %s1801_s0, 1024 }
  0x14   :  { %s18_s8 = sshll.u32 %s1603_s7, 4  ;;  %p1529_p8 = scmp.ne.s32.totalorder %s1801_s0, %s1528_s11  ;;  %s19_s8 = int_to_ptr.vmem [resolvable:$true] %s18_s8 }
  0x15   :  { %p1532_p9 = scmp.lt.u32.totalorder %s1528_s11, %s1801_s0 }
  0x17   :  { %p1534_p10 = pnand %p1532_p9, %p1529_p8 }
  0x19   :  { %1537 = shalt.err (!%p1534_p10)
}
  0x1a   :  { %s1538_s16 = scalar_lea.vmem %s19_s8, 1024  ;;  %p1543_p12 = scmp.lt.s32.totalorder %s19_s8, %s19_s8 }
  0x1b   :  { %p1539_p11 = scmp.ne.s32.totalorder %s19_s8, %s1538_s16  ;;  %p1544_p13 = scmp.lt.s32.totalorder %s1538_s16, %s1538_s16 }
  0x1d   :  { %p1545_p0 = por %p1544_p13, %p1543_p12 }
  0x1f   :  { %p1546_p1 = pnand %p1545_p0, %p1539_p11 }
  0x21   :  { %1549 = shalt.err (!%p1546_p1)
}
  0x22   :  { %s1604_s1 = smov 64   ;;  %s1605_s17 = smov 4  }
  0x23   :  { %24 = dma.hbm_to_vmem [thread:$0]  %s1801_s0, 1024, %s19_s8, [#allocation3], %s1604_s1, %s1604_s1, %s1605_s17  }
  0x24   :  { %s1606_s20 = smov [#allocation7]   ;;  %s1550_s24 = scalar_lea.hbm %s1804_s3, 4096 }
  0x25   :  { %s44_s21 = sshll.u32 %s1606_s20, 4  ;;  %p1551_p2 = scmp.ne.s32.totalorder %s1804_s3, %s1550_s24  ;;  %s45_s21 = int_to_ptr.vmem [resolvable:$true] %s44_s21 }
  0x26   :  { %p1554_p3 = scmp.lt.u32.totalorder %s1550_s24, %s1804_s3 }
  0x28   :  { %p1556_p4 = pnand %p1554_p3, %p1551_p2 }
  0x2a   :  { %1559 = shalt.err (!%p1556_p4)
}
  0x2b   :  { %s1560_s29 = scalar_lea.vmem %s45_s21, 4096  ;;  %p1565_p6 = scmp.lt.s32.totalorder %s45_s21, %s45_s21 }
  0x2c   :  { %p1561_p5 = scmp.ne.s32.totalorder %s45_s21, %s1560_s29  ;;  %p1566_p7 = scmp.lt.s32.totalorder %s1560_s29, %s1560_s29 }
  0x2e   :  { %p1567_p8 = por %p1566_p7, %p1565_p6 }
  0x30   :  { %p1568_p9 = pnand %p1567_p8, %p1561_p5 }
  0x32   :  { %1571 = shalt.err (!%p1568_p9)
}
  0x33   :  { %50 = dma.hbm_to_vmem [thread:$0]  %s1804_s3, 4096, %s45_s21, [#allocation6], %s1604_s1, %s1604_s1, %s1605_s17  }
  0x34   :  { %1594 = dma.done.wait [#allocation3], 1024  }
  0x35   :  { %1595 = vsyncadd [#allocation3], 4294966272 }
  0x36   :  { %1596 = dma.done.wait [#allocation6], 8192  }
  0x37   :  { %1597 = vsyncadd [#allocation6], 4294959104  ;;  %v1607_v0 = vmov 0   ;;  %v1418_v1 = vld [vmem:[#allocation5 + $0x4] ss:$16 sps:$4 sm:$0xff]   ;;  %v1478_v38 = vld [vmem:[#allocation7 + $0x48] sm:$0xff]  }
  0x38   :  { %400 = vmatprep.mubr.bf16.mxu0 %v1607_v0  ;;  %513 = vmatprep.mubr.bf16.mxu1 %v1607_v0  ;;  %v1420_v2 = vld [vmem:[#allocation5 + $0xc] ss:$16 sps:$4 sm:$0xff]   ;;  %v1422_v3 = vld [vmem:[#allocation5] ss:$16 sps:$4 sm:$0xff]   ;;  %v1423_v4 = vld [vmem:[#allocation5 + $0x8] ss:$16 sps:$4 sm:$0xff]  }
  0x39   :  { %368 = vmatprep.subr.bf16.mxu0 %v1418_v1  ;;  %481 = vmatprep.subr.bf16.mxu1 %v1420_v2  ;;  %v1424_v5 = vld [vmem:[#allocation5 + $0x24] ss:$16 sps:$4 sm:$0xff]   ;;  %v1426_v6 = vld [vmem:[#allocation5 + $0x2c] ss:$16 sps:$4 sm:$0xff]   ;;  %v1428_v7 = vld [vmem:[#allocation5 + $0x20] ss:$16 sps:$4 sm:$0xff]  }
  0x3a   :  { %369 = vmatpush1.bf16.msra.mxu0 %v1422_v3  ;;  %482 = vmatpush1.bf16.msra.mxu1 %v1423_v4  ;;  %v1429_v8 = vld [vmem:[#allocation5 + $0x28] ss:$16 sps:$4 sm:$0xff]   ;;  %v1430_v9 = vld [vmem:[#allocation5 + $0x44] ss:$16 sps:$4 sm:$0xff]   ;;  %v1432_v10 = vld [vmem:[#allocation5 + $0x4c] ss:$16 sps:$4 sm:$0xff]  }
  0x3b   :  { %370 = vmatprep.subr.bf16.mxu0 %v1424_v5  ;;  %483 = vmatprep.subr.bf16.mxu1 %v1426_v6  ;;  %v1434_v11 = vld [vmem:[#allocation5 + $0x40] ss:$16 sps:$4 sm:$0xff]   ;;  %v1435_v12 = vld [vmem:[#allocation5 + $0x48] ss:$16 sps:$4 sm:$0xff]   ;;  %v1436_v13 = vld [vmem:[#allocation5 + $0x64] ss:$16 sps:$4 sm:$0xff]  }
  0x3c   :  { %v1438_v14 = vld [vmem:[#allocation5 + $0x6c] ss:$16 sps:$4 sm:$0xff]   ;;  %v1440_v15 = vld [vmem:[#allocation5 + $0x60] ss:$16 sps:$4 sm:$0xff]   ;;  %v1441_v16 = vld [vmem:[#allocation5 + $0x68] ss:$16 sps:$4 sm:$0xff]  }
  0x3d   :  { %v1442_v17 = vld [vmem:[#allocation5 + $0x84] ss:$16 sps:$4 sm:$0xff]   ;;  %v1444_v18 = vld [vmem:[#allocation5 + $0x8c] ss:$16 sps:$4 sm:$0xff]   ;;  %v1446_v19 = vld [vmem:[#allocation5 + $0x80] ss:$16 sps:$4 sm:$0xff]  }
  0x3e   :  { %371 = vmatpush1.bf16.msra.mxu0 %v1428_v7  ;;  %484 = vmatpush1.bf16.msra.mxu1 %v1429_v8  ;;  %v1447_v20 = vld [vmem:[#allocation5 + $0x88] ss:$16 sps:$4 sm:$0xff]   ;;  %v1448_v21 = vld [vmem:[#allocation5 + $0xa4] ss:$16 sps:$4 sm:$0xff]   ;;  %v1450_v22 = vld [vmem:[#allocation5 + $0xac] ss:$16 sps:$4 sm:$0xff]  }
  0x3f   :  { %372 = vmatprep.subr.bf16.mxu0 %v1430_v9  ;;  %485 = vmatprep.subr.bf16.mxu1 %v1432_v10  ;;  %v1452_v23 = vld [vmem:[#allocation5 + $0xa0] ss:$16 sps:$4 sm:$0xff]   ;;  %v1453_v24 = vld [vmem:[#allocation5 + $0xa8] ss:$16 sps:$4 sm:$0xff]   ;;  %v1454_v25 = vld [vmem:[#allocation5 + $0xc4] ss:$16 sps:$4 sm:$0xff]   ;;  %v140_v10 = vlaneseq }
  0x40   :  { %v1456_v26 = vld [vmem:[#allocation5 + $0xcc] ss:$16 sps:$4 sm:$0xff]   ;;  %v1458_v27 = vld [vmem:[#allocation5 + $0xc0] ss:$16 sps:$4 sm:$0xff]   ;;  %v1459_v28 = vld [vmem:[#allocation5 + $0xc8] ss:$16 sps:$4 sm:$0xff]  }
  0x41   :  { %v1460_v29 = vld [vmem:[#allocation5 + $0xe4] ss:$16 sps:$4 sm:$0xff]   ;;  %v1462_v30 = vld [vmem:[#allocation5 + $0xec] ss:$16 sps:$4 sm:$0xff]   ;;  %v1464_v31 = vld [vmem:[#allocation5 + $0xe0] ss:$16 sps:$4 sm:$0xff]  }
  0x42   :  { %373 = vmatpush1.bf16.msra.mxu0 %v1434_v11  ;;  %486 = vmatpush1.bf16.msra.mxu1 %v1435_v12  ;;  %v1465_v32 = vld [vmem:[#allocation5 + $0xe8] ss:$16 sps:$4 sm:$0xff]   ;;  %v1466_v33 = vld [vmem:[#allocation2] sm:$0xff]   ;;  %v1482_v43 = vld [vmem:[#allocation7 + $0x50] sm:$0xff]   ;;  %v141_v11 = vshrl.u32 %v140_v10, 7 }
  0x43   :  { %374 = vmatprep.subr.bf16.mxu0 %v1436_v13  ;;  %487 = vmatprep.subr.bf16.mxu1 %v1438_v14  ;;  %v1474_v34 = vld [vmem:[#allocation7 + $0x40] sm:$0xff]   ;;  %v1479_v39 = vld [vmem:[#allocation7 + $0xc8] sm:$0xff]   ;;  %v1483_v44 = vld [vmem:[#allocation7 + $0xd0] sm:$0xff]  }
  0x44   :  { %v1475_v35 = vld [vmem:[#allocation7 + $0xc0] sm:$0xff]   ;;  %v1480_v40 = vld [vmem:[#allocation7 + $0x8] sm:$0xff]   ;;  %v1484_v45 = vld [vmem:[#allocation7 + $0x10] sm:$0xff]   ;;  %v142_v12 = vsub.s32 0, %v141_v11  ;;  %v150_v13 = vsub.s32 2, %v141_v11 }
  0x45   :  { %v1476_v36 = vld [vmem:[#allocation7] sm:$0xff]   ;;  %v1467_v41 = vld [vmem:[#allocation2 + $0x8] sm:$0xff]   ;;  %v1485_v46 = vld [vmem:[#allocation7 + $0x90] sm:$0xff]  }
  0x46   :  { %375 = vmatpush1.bf16.msra.mxu0 %v1440_v15  ;;  %488 = vmatpush1.bf16.msra.mxu1 %v1441_v16  ;;  %v1477_v37 = vld [vmem:[#allocation7 + $0x80] sm:$0xff]   ;;  %v1481_v42 = vld [vmem:[#allocation7 + $0x88] sm:$0xff]   ;;  %v1486_v47 = vld [vmem:[#allocation7 + $0x58] sm:$0xff]   ;;  %v154_v15 = vsub.s32 3, %v141_v11 }
  0x47   :  { %376 = vmatprep.subr.bf16.mxu0 %v1442_v17  ;;  %489 = vmatprep.subr.bf16.mxu1 %v1444_v18  ;;  %v1487_v48 = vld [vmem:[#allocation7 + $0xd8] sm:$0xff]   ;;  %v1468_v50 = vld [vmem:[#allocation2 + $0x10] sm:$0xff]   ;;  %v1490_v52 = vld [vmem:[#allocation7 + $0x60] sm:$0xff]  }
  0x48   :  { %v1488_v49 = vld [vmem:[#allocation7 + $0x18] sm:$0xff]   ;;  %v1491_v53 = vld [vmem:[#allocation7 + $0xe0] sm:$0xff]   ;;  %v1494_v56 = vld [vmem:[#allocation7 + $0x68] sm:$0xff]  }
  0x49   :  { %v1489_v51 = vld [vmem:[#allocation7 + $0x98] sm:$0xff]   ;;  %v1492_v54 = vld [vmem:[#allocation7 + $0x20] sm:$0xff]   ;;  %v1495_v57 = vld [vmem:[#allocation7 + $0xe8] sm:$0xff]  }
  0x4a   :  { %377 = vmatpush1.bf16.msra.mxu0 %v1446_v19  ;;  %490 = vmatpush1.bf16.msra.mxu1 %v1447_v20  ;;  %v1493_v55 = vld [vmem:[#allocation7 + $0xa0] sm:$0xff]   ;;  %v1496_v58 = vld [vmem:[#allocation7 + $0x28] sm:$0xff]   ;;  %v1469_v59 = vld [vmem:[#allocation2 + $0x18] sm:$0xff]  }
  0x4b   :  { %378 = vmatprep.subr.bf16.mxu0 %v1448_v21  ;;  %491 = vmatprep.subr.bf16.mxu1 %v1450_v22  ;;  %v1497_v60 = vld [vmem:[#allocation7 + $0xa8] sm:$0xff]   ;;  %v1498_v61 = vld [vmem:[#allocation7 + $0x70] sm:$0xff]   ;;  %v1470_v2 = vld [vmem:[#allocation2 + $0x20] sm:$0xff]  }
  0x4c   :  { %v1499_v62 = vld [vmem:[#allocation7 + $0xf0] sm:$0xff]   ;;  %v1471_v3 = vld [vmem:[#allocation2 + $0x28] sm:$0xff]   ;;  %v1473_v5 = vld [vmem:[#allocation2 + $0x38] sm:$0xff]  }
  0x4d   :  { %v1500_v63 = vld [vmem:[#allocation7 + $0x30] sm:$0xff]   ;;  %v1502_v6 = vld [vmem:[#allocation7 + $0x78] sm:$0xff]   ;;  %v138_v14 = vld [vmem:[%s1803_s2] sm:$0xf] }
  0x4e   :  { %379 = vmatpush1.bf16.msra.mxu0 %v1452_v23  ;;  %492 = vmatpush1.bf16.msra.mxu1 %v1453_v24  ;;  %v1501_v1 = vld [vmem:[#allocation7 + $0xb0] sm:$0xff]   ;;  %v1503_v7 = vld [vmem:[#allocation7 + $0xf8] sm:$0xff]   ;;  %v1696_v16 = vrot.slane %v138_v14, %v142_v12  ;;  %v1698_v17 = vrot.slane %v138_v14, %v150_v13  ;;  %v1702_v19 = vrot.slane %v138_v14, %v154_v15 }
  0x4f   :  { %380 = vmatprep.subr.bf16.mxu0 %v1454_v25  ;;  %493 = vmatprep.subr.bf16.mxu1 %v1456_v26  ;;  %v1472_v4 = vld [vmem:[#allocation2 + $0x30] sm:$0xff]   ;;  %v1504_v8 = vld [vmem:[#allocation7 + $0x38] sm:$0xff]  }
  0x50   :  { %v1505_v9 = vld [vmem:[#allocation7 + $0xb8] sm:$0xff]  }
  0x52   :  { %381 = vmatpush1.bf16.msra.mxu0 %v1458_v27  ;;  %494 = vmatpush1.bf16.msra.mxu1 %v1459_v28 }
  0x53   :  { %382 = vmatprep.subr.bf16.mxu0 %v1460_v29  ;;  %495 = vmatprep.subr.bf16.mxu1 %v1462_v30 }
  0x56   :  { %383 = vmatpush1.bf16.msra.mxu0 %v1464_v31  ;;  %496 = vmatpush1.bf16.msra.mxu1 %v1465_v32 }
  0x57   :  { %1279 = vmatprep.subr.bf16.mxu0 %v1474_v34  ;;  %1343 = vmatprep.subr.bf16.mxu1 %v1475_v35 }
  0x59   :  { %401 = vmatmul.mubr.bf16.vlgmr.msra.gmra.mrb[0].mxu0 %v1466_v33  ;;  %514 = vmatmul.mubr.bf16.vlgmr.msra.gmra.mrb[0].mxu1 %v1466_v33 }
  0x5a   :  { %410 = vmatprep.mubr.bf16.mxu0 %v1607_v0  ;;  %523 = vmatprep.mubr.bf16.mxu1 %v1607_v0 }
  0x5b   :  { %1280 = vmatpush3.bf16.msra.mxu0 %v1476_v36  ;;  %1344 = vmatpush3.bf16.msra.mxu1 %v1477_v37 }
  0x5c   :  { %1281 = vmatprep.subr.bf16.mxu0 %v1478_v38  ;;  %1345 = vmatprep.subr.bf16.mxu1 %v1479_v39 }
  0x5f   :  { %1282 = vmatpush3.bf16.msra.mxu0 %v1480_v40  ;;  %1346 = vmatpush3.bf16.msra.mxu1 %v1481_v42 }
  0x60   :  { %1283 = vmatprep.subr.bf16.mxu0 %v1482_v43  ;;  %1347 = vmatprep.subr.bf16.mxu1 %v1483_v44 }
  0x61   :  { %411 = vmatmul.mubr.bf16.gmra.mrb[4].mxu0 %v1467_v41  ;;  %524 = vmatmul.mubr.bf16.gmra.mrb[4].mxu1 %v1467_v41 }
  0x62   :  { %420 = vmatprep.mubr.bf16.mxu0 %v1607_v0  ;;  %533 = vmatprep.mubr.bf16.mxu1 %v1607_v0 }
  0x63   :  { %1284 = vmatpush3.bf16.msra.mxu0 %v1484_v45  ;;  %1348 = vmatpush3.bf16.msra.mxu1 %v1485_v46 }
  0x64   :  { %1285 = vmatprep.subr.bf16.mxu0 %v1486_v47  ;;  %1349 = vmatprep.subr.bf16.mxu1 %v1487_v48 }
  0x67   :  { %1286 = vmatpush3.bf16.msra.mxu0 %v1488_v49  ;;  %1350 = vmatpush3.bf16.msra.mxu1 %v1489_v51 }
  0x68   :  { %1287 = vmatprep.subr.bf16.mxu0 %v1490_v52  ;;  %1351 = vmatprep.subr.bf16.mxu1 %v1491_v53 }
  0x69   :  { %421 = vmatmul.mubr.bf16.gmra.mrb[8].mxu0 %v1468_v50  ;;  %534 = vmatmul.mubr.bf16.gmra.mrb[8].mxu1 %v1468_v50 }
  0x6a   :  { %430 = vmatprep.mubr.bf16.mxu0 %v1607_v0  ;;  %543 = vmatprep.mubr.bf16.mxu1 %v1607_v0 }
  0x6b   :  { %1288 = vmatpush3.bf16.msra.mxu0 %v1492_v54  ;;  %1352 = vmatpush3.bf16.msra.mxu1 %v1493_v55 }
  0x6c   :  { %1289 = vmatprep.subr.bf16.mxu0 %v1494_v56  ;;  %1353 = vmatprep.subr.bf16.mxu1 %v1495_v57 }
  0x6f   :  { %1290 = vmatpush3.bf16.msra.mxu0 %v1496_v58  ;;  %1354 = vmatpush3.bf16.msra.mxu1 %v1497_v60 }
  0x70   :  { %1291 = vmatprep.subr.bf16.mxu0 %v1498_v61  ;;  %1355 = vmatprep.subr.bf16.mxu1 %v1499_v62 }
  0x71   :  { %431 = vmatmul.mubr.bf16.gmra.mrb[12].mxu0 %v1469_v59  ;;  %544 = vmatmul.mubr.bf16.gmra.mrb[12].mxu1 %v1469_v59 }
  0x72   :  { %440 = vmatprep.mubr.bf16.mxu0 %v1607_v0  ;;  %553 = vmatprep.mubr.bf16.mxu1 %v1607_v0 }
  0x73   :  { %1292 = vmatpush3.bf16.msra.mxu0 %v1500_v63  ;;  %1356 = vmatpush3.bf16.msra.mxu1 %v1501_v1 }
  0x74   :  { %1293 = vmatprep.subr.bf16.mxu0 %v1502_v6  ;;  %1357 = vmatprep.subr.bf16.mxu1 %v1503_v7 }
  0x77   :  { %1294 = vmatpush3.bf16.msra.mxu0 %v1504_v8  ;;  %1358 = vmatpush3.bf16.msra.mxu1 %v1505_v9 }
  0x79   :  { %441 = vmatmul.mubr.bf16.gmra.mrb[16].mxu0 %v1470_v2  ;;  %554 = vmatmul.mubr.bf16.gmra.mrb[16].mxu1 %v1470_v2 }
  0x7a   :  { %450 = vmatprep.mubr.bf16.mxu0 %v1607_v0  ;;  %563 = vmatprep.mubr.bf16.mxu1 %v1607_v0 }
  0x81   :  { %451 = vmatmul.mubr.bf16.gmra.mrb[20].mxu0 %v1471_v3  ;;  %564 = vmatmul.mubr.bf16.gmra.mrb[20].mxu1 %v1471_v3 }
  0x82   :  { %460 = vmatprep.mubr.bf16.mxu0 %v1607_v0  ;;  %573 = vmatprep.mubr.bf16.mxu1 %v1607_v0 }
  0x89   :  { %461 = vmatmul.mubr.bf16.gmra.mrb[24].mxu0 %v1472_v4  ;;  %574 = vmatmul.mubr.bf16.gmra.mrb[24].mxu1 %v1472_v4 }
  0x8a   :  { %470 = vmatprep.mubr.bf16.mxu0 %v1607_v0  ;;  %583 = vmatprep.mubr.bf16.mxu1 %v1607_v0  ;;  %v146_v0 = vsub.s32 1, %v141_v11 }
  0x8c   :  { %v1700_v18 = vrot.slane %v138_v14, %v146_v0 }
  0x91   :  { %471 = vmatmul.mubr.bf16.gmra.mrb[28].mxu0 %v1473_v5  ;;  %584 = vmatmul.mubr.bf16.gmra.mrb[28].mxu1 %v1473_v5 }
 0x12c   :  { %v402_v20 = vpop.f32.mrb[0].mxu0  ;;  %v515_v21 = vpop.f32.mrb[0].mxu1 }
 0x12d   :  { %v403_v22 = vadd.f32 %v402_v20, %v1696_v16  ;;  %v516_v23 = vadd.f32 %v515_v21, %v1698_v17  ;;  %v404_v24 = vpop.f32.mrb[1].mxu0  ;;  %v517_v25 = vpop.f32.mrb[1].mxu1 }
 0x12e   :  { %v405_v26 = vadd.f32 %v404_v24, %v1700_v18  ;;  %v518_v27 = vadd.f32 %v517_v25, %v1702_v19  ;;  %v406_v28 = vpop.f32.mrb[2].mxu0  ;;  %v519_v29 = vpop.f32.mrb[2].mxu1 }
 0x12f   :  { %v407_v30 = vadd.f32 %v406_v28, %v1696_v16  ;;  %v520_v31 = vadd.f32 %v519_v29, %v1698_v17  ;;  %v408_v32 = vpop.f32.mrb[3].mxu0  ;;  %v521_v33 = vpop.f32.mrb[3].mxu1  ;;  %v594_v36 = vmax.f32 %v403_v22, 0.0  ;;  %v596_v37 = vmax.f32 %v516_v23, 0.0 }
 0x130   :  { %v409_v34 = vadd.f32 %v408_v32, %v1700_v18  ;;  %v522_v35 = vadd.f32 %v521_v33, %v1702_v19  ;;  %v595_v40 = vmax.f32 %v405_v26, 0.0  ;;  %v597_v41 = vmax.f32 %v518_v27, 0.0 }
 0x131   :  { %v598_v38 = vmax.f32 %v407_v30, 0.0  ;;  %v600_v39 = vmax.f32 %v520_v31, 0.0 }
 0x132   :  { %v599_v42 = vmax.f32 %v409_v34, 0.0  ;;  %v601_v43 = vmax.f32 %v522_v35, 0.0 }
 0x133   :  { %v674_v44 = vpack.c.bf16 %v598_v38, %v594_v36  ;;  %v676_v45 = vpack.c.bf16 %v600_v39, %v596_v37 }
 0x134   :  { %v675_v46 = vpack.c.bf16 %v599_v42, %v595_v40  ;;  %v677_v47 = vpack.c.bf16 %v601_v43, %v597_v41  ;;  %v412_v48 = vpop.f32.mrb[4].mxu0  ;;  %v525_v49 = vpop.f32.mrb[4].mxu1 }
 0x135   :  { %v413_v50 = vadd.f32 %v412_v48, %v1696_v16  ;;  %v526_v51 = vadd.f32 %v525_v49, %v1698_v17  ;;  %v414_v52 = vpop.f32.mrb[5].mxu0  ;;  %v527_v53 = vpop.f32.mrb[5].mxu1 }
 0x136   :  { %v415_v54 = vadd.f32 %v414_v52, %v1700_v18  ;;  %v528_v55 = vadd.f32 %v527_v53, %v1702_v19  ;;  %v416_v56 = vpop.f32.mrb[6].mxu0  ;;  %v529_v57 = vpop.f32.mrb[6].mxu1  ;;  %994 = vmatprep.mubr.bf16.mxu0 %v675_v46  ;;  %1091 = vmatprep.mubr.bf16.mxu1 %v677_v47 }
 0x137   :  { %v417_v58 = vadd.f32 %v416_v56, %v1696_v16  ;;  %v530_v59 = vadd.f32 %v529_v57, %v1698_v17  ;;  %v418_v60 = vpop.f32.mrb[7].mxu0  ;;  %v531_v61 = vpop.f32.mrb[7].mxu1  ;;  %995 = vmatmul.mubr.bf16.vlgmr.msra.gmra.mrb[32].mxu0 %v674_v44  ;;  %1092 = vmatmul.mubr.bf16.vlgmr.msra.gmra.mrb[32].mxu1 %v676_v45  ;;  %v602_v1 = vmax.f32 %v413_v50, 0.0  ;;  %v604_v2 = vmax.f32 %v526_v51, 0.0 }
 0x138   :  { %v419_v62 = vadd.f32 %v418_v60, %v1700_v18  ;;  %v532_v63 = vadd.f32 %v531_v61, %v1702_v19  ;;  %v603_v5 = vmax.f32 %v415_v54, 0.0  ;;  %v605_v6 = vmax.f32 %v528_v55, 0.0 }
 0x139   :  { %v606_v3 = vmax.f32 %v417_v58, 0.0  ;;  %v608_v4 = vmax.f32 %v530_v59, 0.0 }
 0x13a   :  { %v607_v7 = vmax.f32 %v419_v62, 0.0  ;;  %v609_v8 = vmax.f32 %v532_v63, 0.0 }
 0x13b   :  { %v678_v9 = vpack.c.bf16 %v606_v3, %v602_v1  ;;  %v680_v10 = vpack.c.bf16 %v608_v4, %v604_v2 }
 0x13c   :  { %v679_v11 = vpack.c.bf16 %v607_v7, %v603_v5  ;;  %v681_v12 = vpack.c.bf16 %v609_v8, %v605_v6  ;;  %v422_v13 = vpop.f32.mrb[8].mxu0  ;;  %v535_v14 = vpop.f32.mrb[8].mxu1 }
 0x13d   :  { %v423_v0 = vadd.f32 %v422_v13, %v1696_v16  ;;  %v536_v15 = vadd.f32 %v535_v14, %v1698_v17  ;;  %v424_v20 = vpop.f32.mrb[9].mxu0  ;;  %v537_v21 = vpop.f32.mrb[9].mxu1 }
 0x13e   :  { %v425_v22 = vadd.f32 %v424_v20, %v1700_v18  ;;  %v538_v23 = vadd.f32 %v537_v21, %v1702_v19  ;;  %v426_v24 = vpop.f32.mrb[10].mxu0  ;;  %v539_v25 = vpop.f32.mrb[10].mxu1  ;;  %1002 = vmatprep.mubr.bf16.mxu0 %v679_v11  ;;  %1099 = vmatprep.mubr.bf16.mxu1 %v681_v12 }
 0x13f   :  { %v427_v26 = vadd.f32 %v426_v24, %v1696_v16  ;;  %v540_v27 = vadd.f32 %v539_v25, %v1698_v17  ;;  %v428_v28 = vpop.f32.mrb[11].mxu0  ;;  %v541_v29 = vpop.f32.mrb[11].mxu1  ;;  %1003 = vmatmul.mubr.bf16.gmra.mrb[36].mxu0 %v678_v9  ;;  %1100 = vmatmul.mubr.bf16.gmra.mrb[36].mxu1 %v680_v10  ;;  %v610_v32 = vmax.f32 %v423_v0, 0.0  ;;  %v612_v33 = vmax.f32 %v536_v15, 0.0 }
 0x140   :  { %v429_v30 = vadd.f32 %v428_v28, %v1700_v18  ;;  %v542_v31 = vadd.f32 %v541_v29, %v1702_v19  ;;  %v611_v36 = vmax.f32 %v425_v22, 0.0  ;;  %v613_v37 = vmax.f32 %v538_v23, 0.0 }
 0x141   :  { %v614_v34 = vmax.f32 %v427_v26, 0.0  ;;  %v616_v35 = vmax.f32 %v540_v27, 0.0 }
 0x142   :  { %v615_v38 = vmax.f32 %v429_v30, 0.0  ;;  %v617_v39 = vmax.f32 %v542_v31, 0.0 }
 0x143   :  { %v682_v40 = vpack.c.bf16 %v614_v34, %v610_v32  ;;  %v684_v41 = vpack.c.bf16 %v616_v35, %v612_v33 }
 0x144   :  { %v683_v42 = vpack.c.bf16 %v615_v38, %v611_v36  ;;  %v685_v43 = vpack.c.bf16 %v617_v39, %v613_v37  ;;  %v432_v44 = vpop.f32.mrb[12].mxu0  ;;  %v545_v45 = vpop.f32.mrb[12].mxu1 }
 0x145   :  { %v433_v46 = vadd.f32 %v432_v44, %v1696_v16  ;;  %v546_v47 = vadd.f32 %v545_v45, %v1698_v17  ;;  %v434_v48 = vpop.f32.mrb[13].mxu0  ;;  %v547_v49 = vpop.f32.mrb[13].mxu1 }
 0x146   :  { %v435_v50 = vadd.f32 %v434_v48, %v1700_v18  ;;  %v548_v51 = vadd.f32 %v547_v49, %v1702_v19  ;;  %v436_v52 = vpop.f32.mrb[14].mxu0  ;;  %v549_v53 = vpop.f32.mrb[14].mxu1  ;;  %1010 = vmatprep.mubr.bf16.mxu0 %v683_v42  ;;  %1107 = vmatprep.mubr.bf16.mxu1 %v685_v43 }
 0x147   :  { %v437_v54 = vadd.f32 %v436_v52, %v1696_v16  ;;  %v550_v55 = vadd.f32 %v549_v53, %v1698_v17  ;;  %v438_v56 = vpop.f32.mrb[15].mxu0  ;;  %v551_v57 = vpop.f32.mrb[15].mxu1  ;;  %1011 = vmatmul.mubr.bf16.gmra.mrb[40].mxu0 %v682_v40  ;;  %1108 = vmatmul.mubr.bf16.gmra.mrb[40].mxu1 %v684_v41  ;;  %v618_v60 = vmax.f32 %v433_v46, 0.0  ;;  %v620_v61 = vmax.f32 %v546_v47, 0.0 }
 0x148   :  { %v439_v58 = vadd.f32 %v438_v56, %v1700_v18  ;;  %v552_v59 = vadd.f32 %v551_v57, %v1702_v19  ;;  %v619_v1 = vmax.f32 %v435_v50, 0.0  ;;  %v621_v2 = vmax.f32 %v548_v51, 0.0 }
 0x149   :  { %v622_v62 = vmax.f32 %v437_v54, 0.0  ;;  %v624_v63 = vmax.f32 %v550_v55, 0.0 }
 0x14a   :  { %v623_v3 = vmax.f32 %v439_v58, 0.0  ;;  %v625_v4 = vmax.f32 %v552_v59, 0.0 }
 0x14b   :  { %v686_v5 = vpack.c.bf16 %v622_v62, %v618_v60  ;;  %v688_v6 = vpack.c.bf16 %v624_v63, %v620_v61 }
 0x14c   :  { %v687_v7 = vpack.c.bf16 %v623_v3, %v619_v1  ;;  %v689_v8 = vpack.c.bf16 %v625_v4, %v621_v2  ;;  %v442_v9 = vpop.f32.mrb[16].mxu0  ;;  %v555_v10 = vpop.f32.mrb[16].mxu1 }
 0x14d   :  { %v443_v11 = vadd.f32 %v442_v9, %v1696_v16  ;;  %v556_v12 = vadd.f32 %v555_v10, %v1698_v17  ;;  %v444_v13 = vpop.f32.mrb[17].mxu0  ;;  %v557_v14 = vpop.f32.mrb[17].mxu1 }
 0x14e   :  { %v445_v0 = vadd.f32 %v444_v13, %v1700_v18  ;;  %v558_v15 = vadd.f32 %v557_v14, %v1702_v19  ;;  %v446_v20 = vpop.f32.mrb[18].mxu0  ;;  %v559_v21 = vpop.f32.mrb[18].mxu1  ;;  %1018 = vmatprep.mubr.bf16.mxu0 %v687_v7  ;;  %1115 = vmatprep.mubr.bf16.mxu1 %v689_v8 }
 0x14f   :  { %v447_v22 = vadd.f32 %v446_v20, %v1696_v16  ;;  %v560_v23 = vadd.f32 %v559_v21, %v1698_v17  ;;  %v448_v24 = vpop.f32.mrb[19].mxu0  ;;  %v561_v25 = vpop.f32.mrb[19].mxu1  ;;  %1019 = vmatmul.mubr.bf16.gmra.mrb[44].mxu0 %v686_v5  ;;  %1116 = vmatmul.mubr.bf16.gmra.mrb[44].mxu1 %v688_v6  ;;  %v626_v28 = vmax.f32 %v443_v11, 0.0  ;;  %v628_v29 = vmax.f32 %v556_v12, 0.0 }
 0x150   :  { %v449_v26 = vadd.f32 %v448_v24, %v1700_v18  ;;  %v562_v27 = vadd.f32 %v561_v25, %v1702_v19  ;;  %v627_v32 = vmax.f32 %v445_v0, 0.0  ;;  %v629_v33 = vmax.f32 %v558_v15, 0.0 }
 0x151   :  { %v630_v30 = vmax.f32 %v447_v22, 0.0  ;;  %v632_v31 = vmax.f32 %v560_v23, 0.0 }
 0x152   :  { %v631_v34 = vmax.f32 %v449_v26, 0.0  ;;  %v633_v35 = vmax.f32 %v562_v27, 0.0 }
 0x153   :  { %v690_v36 = vpack.c.bf16 %v630_v30, %v626_v28  ;;  %v692_v37 = vpack.c.bf16 %v632_v31, %v628_v29 }
 0x154   :  { %v691_v38 = vpack.c.bf16 %v631_v34, %v627_v32  ;;  %v693_v39 = vpack.c.bf16 %v633_v35, %v629_v33  ;;  %v452_v40 = vpop.f32.mrb[20].mxu0  ;;  %v565_v41 = vpop.f32.mrb[20].mxu1 }
 0x155   :  { %v453_v42 = vadd.f32 %v452_v40, %v1696_v16  ;;  %v566_v43 = vadd.f32 %v565_v41, %v1698_v17  ;;  %v454_v44 = vpop.f32.mrb[21].mxu0  ;;  %v567_v45 = vpop.f32.mrb[21].mxu1 }
 0x156   :  { %v455_v46 = vadd.f32 %v454_v44, %v1700_v18  ;;  %v568_v47 = vadd.f32 %v567_v45, %v1702_v19  ;;  %v456_v48 = vpop.f32.mrb[22].mxu0  ;;  %v569_v49 = vpop.f32.mrb[22].mxu1  ;;  %1026 = vmatprep.mubr.bf16.mxu0 %v691_v38  ;;  %1123 = vmatprep.mubr.bf16.mxu1 %v693_v39 }
 0x157   :  { %v457_v50 = vadd.f32 %v456_v48, %v1696_v16  ;;  %v570_v51 = vadd.f32 %v569_v49, %v1698_v17  ;;  %v458_v52 = vpop.f32.mrb[23].mxu0  ;;  %v571_v53 = vpop.f32.mrb[23].mxu1  ;;  %1027 = vmatmul.mubr.bf16.gmra.mrb[48].mxu0 %v690_v36  ;;  %1124 = vmatmul.mubr.bf16.gmra.mrb[48].mxu1 %v692_v37  ;;  %v634_v56 = vmax.f32 %v453_v42, 0.0  ;;  %v636_v57 = vmax.f32 %v566_v43, 0.0 }
 0x158   :  { %v459_v54 = vadd.f32 %v458_v52, %v1700_v18  ;;  %v572_v55 = vadd.f32 %v571_v53, %v1702_v19  ;;  %v635_v60 = vmax.f32 %v455_v46, 0.0  ;;  %v637_v61 = vmax.f32 %v568_v47, 0.0 }
 0x159   :  { %v638_v58 = vmax.f32 %v457_v50, 0.0  ;;  %v640_v59 = vmax.f32 %v570_v51, 0.0 }
 0x15a   :  { %v639_v62 = vmax.f32 %v459_v54, 0.0  ;;  %v641_v63 = vmax.f32 %v572_v55, 0.0 }
 0x15b   :  { %v694_v1 = vpack.c.bf16 %v638_v58, %v634_v56  ;;  %v696_v2 = vpack.c.bf16 %v640_v59, %v636_v57 }
 0x15c   :  { %v695_v3 = vpack.c.bf16 %v639_v62, %v635_v60  ;;  %v697_v4 = vpack.c.bf16 %v641_v63, %v637_v61  ;;  %v462_v5 = vpop.f32.mrb[24].mxu0  ;;  %v575_v6 = vpop.f32.mrb[24].mxu1 }
 0x15d   :  { %v463_v7 = vadd.f32 %v462_v5, %v1696_v16  ;;  %v576_v8 = vadd.f32 %v575_v6, %v1698_v17  ;;  %v464_v9 = vpop.f32.mrb[25].mxu0  ;;  %v577_v10 = vpop.f32.mrb[25].mxu1  ;;  %v1771_v5 = vld [vmem:[%s1805_s4] ss:$0 sm:$0xff]  ;;  %s1608_s4 = smov [#allocation8]  }
 0x15e   :  { %v465_v11 = vadd.f32 %v464_v9, %v1700_v18  ;;  %v578_v12 = vadd.f32 %v577_v10, %v1702_v19  ;;  %v466_v13 = vpop.f32.mrb[26].mxu0  ;;  %v579_v14 = vpop.f32.mrb[26].mxu1  ;;  %1034 = vmatprep.mubr.bf16.mxu0 %v695_v3  ;;  %1131 = vmatprep.mubr.bf16.mxu1 %v697_v4  ;;  %s1193_s8 = sshll.u32 %s1608_s4, 4  ;;  %s1194_s8 = int_to_ptr.vmem [resolvable:$true] %s1193_s8 }
 0x15f   :  { %v467_v0 = vadd.f32 %v466_v13, %v1696_v16  ;;  %v580_v15 = vadd.f32 %v579_v14, %v1698_v17  ;;  %v468_v20 = vpop.f32.mrb[27].mxu0  ;;  %v581_v21 = vpop.f32.mrb[27].mxu1  ;;  %1035 = vmatmul.mubr.bf16.gmra.mrb[52].mxu0 %v694_v1  ;;  %1132 = vmatmul.mubr.bf16.gmra.mrb[52].mxu1 %v696_v2  ;;  %v642_v24 = vmax.f32 %v463_v7, 0.0  ;;  %v644_v25 = vmax.f32 %v576_v8, 0.0  ;;  %s1572_s9 = scalar_lea.vmem %s1194_s8, 2048  ;;  %p1577_p11 = scmp.lt.s32.totalorder %s1194_s8, %s1194_s8 }
 0x160   :  { %v469_v22 = vadd.f32 %v468_v20, %v1700_v18  ;;  %v582_v23 = vadd.f32 %v581_v21, %v1702_v19  ;;  %v643_v28 = vmax.f32 %v465_v11, 0.0  ;;  %v645_v29 = vmax.f32 %v578_v12, 0.0  ;;  %p1573_p10 = scmp.ne.s32.totalorder %s1194_s8, %s1572_s9  ;;  %p1578_p12 = scmp.lt.s32.totalorder %s1572_s9, %s1572_s9 }
 0x161   :  { %v646_v26 = vmax.f32 %v467_v0, 0.0  ;;  %v648_v27 = vmax.f32 %v580_v15, 0.0 }
 0x162   :  { %v647_v30 = vmax.f32 %v469_v22, 0.0  ;;  %v649_v31 = vmax.f32 %v582_v23, 0.0  ;;  %p1579_p13 = por %p1578_p12, %p1577_p11 }
 0x163   :  { %v698_v32 = vpack.c.bf16 %v646_v26, %v642_v24  ;;  %v700_v33 = vpack.c.bf16 %v648_v27, %v644_v25 }
 0x164   :  { %v699_v34 = vpack.c.bf16 %v647_v30, %v643_v28  ;;  %v701_v35 = vpack.c.bf16 %v649_v31, %v645_v29  ;;  %v472_v36 = vpop.f32.mrb[28].mxu0  ;;  %v585_v37 = vpop.f32.mrb[28].mxu1  ;;  %p1580_p0 = pnand %p1579_p13, %p1573_p10 }
 0x165   :  { %v473_v38 = vadd.f32 %v472_v36, %v1696_v16  ;;  %v586_v39 = vadd.f32 %v585_v37, %v1698_v17  ;;  %v474_v40 = vpop.f32.mrb[29].mxu0  ;;  %v587_v41 = vpop.f32.mrb[29].mxu1 }
 0x166   :  { %v475_v42 = vadd.f32 %v474_v40, %v1700_v18  ;;  %v588_v43 = vadd.f32 %v587_v41, %v1702_v19  ;;  %v476_v44 = vpop.f32.mrb[30].mxu0  ;;  %v589_v45 = vpop.f32.mrb[30].mxu1  ;;  %1042 = vmatprep.mubr.bf16.mxu0 %v699_v34  ;;  %1139 = vmatprep.mubr.bf16.mxu1 %v701_v35 }
 0x167   :  { %v477_v46 = vadd.f32 %v476_v44, %v1696_v16  ;;  %v590_v47 = vadd.f32 %v589_v45, %v1698_v17  ;;  %v478_v48 = vpop.f32.mrb[31].mxu0  ;;  %v591_v49 = vpop.f32.mrb[31].mxu1  ;;  %1043 = vmatmul.mubr.bf16.gmra.mrb[56].mxu0 %v698_v32  ;;  %1140 = vmatmul.mubr.bf16.gmra.mrb[56].mxu1 %v700_v33  ;;  %v650_v52 = vmax.f32 %v473_v38, 0.0  ;;  %v652_v53 = vmax.f32 %v586_v39, 0.0 }
 0x168   :  { %v479_v50 = vadd.f32 %v478_v48, %v1700_v18  ;;  %v592_v51 = vadd.f32 %v591_v49, %v1702_v19  ;;  %v651_v56 = vmax.f32 %v475_v42, 0.0  ;;  %v653_v57 = vmax.f32 %v588_v43, 0.0 }
 0x169   :  { %v654_v54 = vmax.f32 %v477_v46, 0.0  ;;  %v656_v55 = vmax.f32 %v590_v47, 0.0 }
 0x16a   :  { %v655_v58 = vmax.f32 %v479_v50, 0.0  ;;  %v657_v59 = vmax.f32 %v592_v51, 0.0 }
 0x16b   :  { %v702_v60 = vpack.c.bf16 %v654_v54, %v650_v52  ;;  %v704_v16 = vpack.c.bf16 %v656_v55, %v652_v53 }
 0x16c   :  { %v703_v61 = vpack.c.bf16 %v655_v58, %v651_v56  ;;  %v705_v17 = vpack.c.bf16 %v657_v59, %v653_v57 }
 0x16e   :  { %1050 = vmatprep.mubr.bf16.mxu0 %v703_v61  ;;  %1147 = vmatprep.mubr.bf16.mxu1 %v705_v17 }
 0x16f   :  { %1051 = vmatmul.mubr.bf16.gmra.mrb[60].mxu0 %v702_v60  ;;  %1148 = vmatmul.mubr.bf16.gmra.mrb[60].mxu1 %v704_v16 }
 0x20a   :  { %v1295_v62 = vpop.f32.mrb[32].mxu0  ;;  %v1359_v18 = vpop.f32.mrb[32].mxu1 }
 0x20b   :  { %v1296_v63 = vpop.f32.mrb[33].mxu0  ;;  %v1360_v19 = vpop.f32.mrb[33].mxu1 }
 0x20c   :  { %v1297_v1 = vadd.f32 %v1296_v63, %v1295_v62  ;;  %v1361_v2 = vadd.f32 %v1360_v19, %v1359_v18  ;;  %v1298_v3 = vpop.f32.mrb[34].mxu0  ;;  %v1362_v4 = vpop.f32.mrb[34].mxu1 }
 0x20d   :  { %v1299_v6 = vpop.f32.mrb[35].mxu0  ;;  %v1363_v7 = vpop.f32.mrb[35].mxu1 }
 0x20e   :  { %v1094_v8 = vadd.f32 %v1361_v2, %v1297_v1  ;;  %v1300_v9 = vadd.f32 %v1299_v6, %v1298_v3  ;;  %v1364_v10 = vadd.f32 %v1363_v7, %v1362_v4 }
 0x210   :  { %v1156_v11 = vadd.f32 %v1771_v5, %v1094_v8  ;;  %v1097_v12 = vadd.f32 %v1364_v10, %v1300_v9 }
 0x212   :  { %1172 = vst [vmem:[#allocation8] sm:$0xff] %v1156_v11  ;;  %v1157_v13 = vadd.f32 %v1771_v5, %v1097_v12  ;;  %v1301_v14 = vpop.f32.mrb[36].mxu0  ;;  %v1365_v0 = vpop.f32.mrb[36].mxu1 }
 0x213   :  { %v1302_v15 = vpop.f32.mrb[37].mxu0  ;;  %v1366_v20 = vpop.f32.mrb[37].mxu1 }
 0x214   :  { %1173 = vst [vmem:[#allocation8 + $0x8] sm:$0xff] %v1157_v13  ;;  %v1303_v21 = vadd.f32 %v1302_v15, %v1301_v14  ;;  %v1367_v22 = vadd.f32 %v1366_v20, %v1365_v0  ;;  %v1304_v23 = vpop.f32.mrb[38].mxu0  ;;  %v1368_v24 = vpop.f32.mrb[38].mxu1 }
 0x215   :  { %v1305_v25 = vpop.f32.mrb[39].mxu0  ;;  %v1369_v26 = vpop.f32.mrb[39].mxu1 }
 0x216   :  { %v1102_v27 = vadd.f32 %v1367_v22, %v1303_v21  ;;  %v1306_v28 = vadd.f32 %v1305_v25, %v1304_v23  ;;  %v1370_v29 = vadd.f32 %v1369_v26, %v1368_v24 }
 0x218   :  { %v1158_v30 = vadd.f32 %v1771_v5, %v1102_v27  ;;  %v1105_v31 = vadd.f32 %v1370_v29, %v1306_v28 }
 0x21a   :  { %1174 = vst [vmem:[#allocation8 + $0x10] sm:$0xff] %v1158_v30  ;;  %v1159_v32 = vadd.f32 %v1771_v5, %v1105_v31  ;;  %v1307_v33 = vpop.f32.mrb[40].mxu0  ;;  %v1371_v34 = vpop.f32.mrb[40].mxu1 }
 0x21b   :  { %v1308_v35 = vpop.f32.mrb[41].mxu0  ;;  %v1372_v36 = vpop.f32.mrb[41].mxu1 }
 0x21c   :  { %1175 = vst [vmem:[#allocation8 + $0x18] sm:$0xff] %v1159_v32  ;;  %v1309_v37 = vadd.f32 %v1308_v35, %v1307_v33  ;;  %v1373_v38 = vadd.f32 %v1372_v36, %v1371_v34  ;;  %v1310_v39 = vpop.f32.mrb[42].mxu0  ;;  %v1374_v40 = vpop.f32.mrb[42].mxu1 }
 0x21d   :  { %v1311_v41 = vpop.f32.mrb[43].mxu0  ;;  %v1375_v42 = vpop.f32.mrb[43].mxu1 }
 0x21e   :  { %v1110_v43 = vadd.f32 %v1373_v38, %v1309_v37  ;;  %v1312_v44 = vadd.f32 %v1311_v41, %v1310_v39  ;;  %v1376_v45 = vadd.f32 %v1375_v42, %v1374_v40 }
 0x220   :  { %v1160_v46 = vadd.f32 %v1771_v5, %v1110_v43  ;;  %v1113_v47 = vadd.f32 %v1376_v45, %v1312_v44 }
 0x222   :  { %1176 = vst [vmem:[#allocation8 + $0x20] sm:$0xff] %v1160_v46  ;;  %v1161_v48 = vadd.f32 %v1771_v5, %v1113_v47  ;;  %v1313_v49 = vpop.f32.mrb[44].mxu0  ;;  %v1377_v50 = vpop.f32.mrb[44].mxu1 }
 0x223   :  { %v1314_v51 = vpop.f32.mrb[45].mxu0  ;;  %v1378_v52 = vpop.f32.mrb[45].mxu1 }
 0x224   :  { %1177 = vst [vmem:[#allocation8 + $0x28] sm:$0xff] %v1161_v48  ;;  %v1315_v53 = vadd.f32 %v1314_v51, %v1313_v49  ;;  %v1379_v54 = vadd.f32 %v1378_v52, %v1377_v50  ;;  %v1316_v55 = vpop.f32.mrb[46].mxu0  ;;  %v1380_v56 = vpop.f32.mrb[46].mxu1 }
 0x225   :  { %v1317_v57 = vpop.f32.mrb[47].mxu0  ;;  %v1381_v58 = vpop.f32.mrb[47].mxu1 }
 0x226   :  { %v1118_v59 = vadd.f32 %v1379_v54, %v1315_v53  ;;  %v1318_v60 = vadd.f32 %v1317_v57, %v1316_v55  ;;  %v1382_v16 = vadd.f32 %v1381_v58, %v1380_v56 }
 0x228   :  { %v1162_v61 = vadd.f32 %v1771_v5, %v1118_v59  ;;  %v1121_v17 = vadd.f32 %v1382_v16, %v1318_v60 }
 0x22a   :  { %1178 = vst [vmem:[#allocation8 + $0x30] sm:$0xff] %v1162_v61  ;;  %v1163_v62 = vadd.f32 %v1771_v5, %v1121_v17  ;;  %v1319_v18 = vpop.f32.mrb[48].mxu0  ;;  %v1383_v63 = vpop.f32.mrb[48].mxu1 }
 0x22b   :  { %v1320_v19 = vpop.f32.mrb[49].mxu0  ;;  %v1384_v1 = vpop.f32.mrb[49].mxu1 }
 0x22c   :  { %1179 = vst [vmem:[#allocation8 + $0x38] sm:$0xff] %v1163_v62  ;;  %v1321_v2 = vadd.f32 %v1320_v19, %v1319_v18  ;;  %v1385_v3 = vadd.f32 %v1384_v1, %v1383_v63  ;;  %v1322_v4 = vpop.f32.mrb[50].mxu0  ;;  %v1386_v6 = vpop.f32.mrb[50].mxu1 }
 0x22d   :  { %v1323_v7 = vpop.f32.mrb[51].mxu0  ;;  %v1387_v8 = vpop.f32.mrb[51].mxu1 }
 0x22e   :  { %v1126_v9 = vadd.f32 %v1385_v3, %v1321_v2  ;;  %v1324_v10 = vadd.f32 %v1323_v7, %v1322_v4  ;;  %v1388_v11 = vadd.f32 %v1387_v8, %v1386_v6 }
 0x230   :  { %v1164_v12 = vadd.f32 %v1771_v5, %v1126_v9  ;;  %v1129_v13 = vadd.f32 %v1388_v11, %v1324_v10 }
 0x232   :  { %1180 = vst [vmem:[#allocation8 + $0x40] sm:$0xff] %v1164_v12  ;;  %v1165_v14 = vadd.f32 %v1771_v5, %v1129_v13  ;;  %v1325_v0 = vpop.f32.mrb[52].mxu0  ;;  %v1389_v15 = vpop.f32.mrb[52].mxu1 }
 0x233   :  { %v1326_v20 = vpop.f32.mrb[53].mxu0  ;;  %v1390_v21 = vpop.f32.mrb[53].mxu1 }
 0x234   :  { %1181 = vst [vmem:[#allocation8 + $0x48] sm:$0xff] %v1165_v14  ;;  %v1327_v22 = vadd.f32 %v1326_v20, %v1325_v0  ;;  %v1391_v23 = vadd.f32 %v1390_v21, %v1389_v15  ;;  %v1328_v24 = vpop.f32.mrb[54].mxu0  ;;  %v1392_v25 = vpop.f32.mrb[54].mxu1 }
 0x235   :  { %v1329_v26 = vpop.f32.mrb[55].mxu0  ;;  %v1393_v27 = vpop.f32.mrb[55].mxu1 }
 0x236   :  { %v1134_v28 = vadd.f32 %v1391_v23, %v1327_v22  ;;  %v1330_v29 = vadd.f32 %v1329_v26, %v1328_v24  ;;  %v1394_v30 = vadd.f32 %v1393_v27, %v1392_v25 }
 0x238   :  { %v1166_v31 = vadd.f32 %v1771_v5, %v1134_v28  ;;  %v1137_v32 = vadd.f32 %v1394_v30, %v1330_v29 }
 0x23a   :  { %1182 = vst [vmem:[#allocation8 + $0x50] sm:$0xff] %v1166_v31  ;;  %v1167_v33 = vadd.f32 %v1771_v5, %v1137_v32  ;;  %v1331_v34 = vpop.f32.mrb[56].mxu0  ;;  %v1395_v35 = vpop.f32.mrb[56].mxu1 }
 0x23b   :  { %v1332_v36 = vpop.f32.mrb[57].mxu0  ;;  %v1396_v37 = vpop.f32.mrb[57].mxu1 }
 0x23c   :  { %1183 = vst [vmem:[#allocation8 + $0x58] sm:$0xff] %v1167_v33  ;;  %v1333_v38 = vadd.f32 %v1332_v36, %v1331_v34  ;;  %v1397_v39 = vadd.f32 %v1396_v37, %v1395_v35  ;;  %v1334_v40 = vpop.f32.mrb[58].mxu0  ;;  %v1398_v41 = vpop.f32.mrb[58].mxu1 }
 0x23d   :  { %v1335_v42 = vpop.f32.mrb[59].mxu0  ;;  %v1399_v43 = vpop.f32.mrb[59].mxu1 }
 0x23e   :  { %v1142_v44 = vadd.f32 %v1397_v39, %v1333_v38  ;;  %v1336_v45 = vadd.f32 %v1335_v42, %v1334_v40  ;;  %v1400_v46 = vadd.f32 %v1399_v43, %v1398_v41 }
 0x240   :  { %v1168_v47 = vadd.f32 %v1771_v5, %v1142_v44  ;;  %v1145_v48 = vadd.f32 %v1400_v46, %v1336_v45 }
 0x242   :  { %1184 = vst [vmem:[#allocation8 + $0x60] sm:$0xff] %v1168_v47  ;;  %v1169_v49 = vadd.f32 %v1771_v5, %v1145_v48  ;;  %v1337_v50 = vpop.f32.mrb[60].mxu0  ;;  %v1401_v51 = vpop.f32.mrb[60].mxu1 }
 0x243   :  { %v1338_v52 = vpop.f32.mrb[61].mxu0  ;;  %v1402_v53 = vpop.f32.mrb[61].mxu1 }
 0x244   :  { %1185 = vst [vmem:[#allocation8 + $0x68] sm:$0xff] %v1169_v49  ;;  %v1339_v54 = vadd.f32 %v1338_v52, %v1337_v50  ;;  %v1403_v55 = vadd.f32 %v1402_v53, %v1401_v51  ;;  %v1340_v56 = vpop.f32.mrb[62].mxu0  ;;  %v1404_v57 = vpop.f32.mrb[62].mxu1 }
 0x245   :  { %v1341_v58 = vpop.f32.mrb[63].mxu0  ;;  %v1405_v59 = vpop.f32.mrb[63].mxu1 }
 0x246   :  { %v1150_v60 = vadd.f32 %v1403_v55, %v1339_v54  ;;  %v1342_v16 = vadd.f32 %v1341_v58, %v1340_v56  ;;  %v1406_v61 = vadd.f32 %v1405_v59, %v1404_v57 }
 0x248   :  { %v1170_v17 = vadd.f32 %v1771_v5, %v1150_v60  ;;  %v1153_v62 = vadd.f32 %v1406_v61, %v1342_v16 }
 0x24a   :  { %1186 = vst [vmem:[#allocation8 + $0x70] sm:$0xff] %v1170_v17  ;;  %v1171_v18 = vadd.f32 %v1771_v5, %v1153_v62 }
 0x24c   :  { %1187 = vst [vmem:[#allocation8 + $0x78] sm:$0xff] %v1171_v18 }
 0x24d   :  { %1583 = shalt.err (!%p1580_p0)
}
 0x24e   :  { %s1584_s12 = scalar_lea.hbm %s1806_s5, 2048 }
 0x24f   :  { %p1585_p1 = scmp.ne.s32.totalorder %s1806_s5, %s1584_s12  ;;  %p1588_p2 = scmp.lt.u32.totalorder %s1584_s12, %s1806_s5 }
 0x251   :  { %p1590_p3 = pnand %p1588_p2, %p1585_p1 }
 0x253   :  { %1593 = shalt.err (!%p1590_p3)
}
 0x254   :  { %s1609_s1 = smov 128   ;;  %s1610_s17 = smov 8  }
 0x255   :  { %1199 = dma.vmem_to_hbm [thread:$0]  %s1194_s8, 2048, %s1806_s5, [#allocation4], %s1609_s1, %s1609_s1, %s1610_s17  }
 0x256   :  { %1598 = dma.done.wait [#allocation4], 2048  }
 0x257   :  { %1599 = vsyncadd [#allocation4], 4294965248 }
 0x258   :  { %1203 = vsyncpa [#allocation3], 1 }
 0x259   :  { %1204 = vsyncpa [#allocation6], 1 }
 0x25a   :  { %1205 = vsyncpa [#allocation4], 1 }

</bundles_post_ra>
